<compile_context>
chip_gen: v6e
topology: v6e:2x2x1
jax: 0.10.0
libtpu: 0.0.40
codegen_flags: <defaults>
</compile_context>

<pallas_src>
import functools
import math

import jax
import jax.numpy as jnp
from jax import lax
from jax.experimental import pallas as pl
from jax.experimental.pallas import tpu as pltpu


# ------------------------------------------------------------------ helpers --
def _tile(dim, pref):
    """Largest tile <= pref that divides dim."""
    t = min(pref, dim)
    while dim % t:
        t -= 1
    return t


@functools.lru_cache(maxsize=None)
def _vmem_limit_bytes():
    # Generation-aware scoped-VMEM budget: ~3/4 of physical VMEM
    # (v5e/v6e: 128 MiB -> 96 MiB, v7x: 64 MiB -> 48 MiB).
    try:
        cap = pltpu.get_tpu_info().vmem_capacity_bytes
    except Exception:
        cap = 64 * 1024 * 1024
    return int(min(cap * 3 // 4, 112 * 1024 * 1024))


def _mosaic_params(dims):
    return pltpu.CompilerParams(
        dimension_semantics=dims,
        vmem_limit_bytes=_vmem_limit_bytes(),
    )


def _rope(x, cos, sin):
    # rotate_half(x) = concat(-x2, x1): roll by d/2 (symmetric for half-shift)
    # then flip the sign of the first half.
    d = x.shape[-1]
    rolled = pltpu.roll(x, shift=d // 2, axis=x.ndim - 1)
    idx = lax.broadcasted_iota(jnp.int32, x.shape, x.ndim - 1)
    sign = jnp.where(idx < d // 2, -1.0, 1.0).astype(x.dtype)
    return x * cos + rolled * sign * sin


# ------------------------------------------- fused RMSNorm + QKV projection --
def _ln_qkv_kernel(x_ref, w_ref, wqkv_ref, o_ref, xn_sc, *, eps):
    @pl.when(pl.program_id(1) == 0)
    def _():
        x = x_ref[...].astype(jnp.float32)
        var = jnp.mean(x * x, axis=-1, keepdims=True)
        xn = x * lax.rsqrt(var + eps) * w_ref[...].astype(jnp.float32)
        xn_sc[...] = xn.astype(jnp.bfloat16)          # RMSNorm computed once

    o_ref[...] = jnp.dot(
        xn_sc[...], wqkv_ref[...], preferred_element_type=jnp.float32
    ).astype(o_ref.dtype)


def ln_qkv_proj(x, ln_w, wqkv, eps, *, tm=512, tn=512):
    M, H = x.shape
    N = wqkv.shape[1]
    tm, tn = _tile(M, tm), _tile(N, tn)
    return pl.pallas_call(
        functools.partial(_ln_qkv_kernel, eps=eps),
        out_shape=jax.ShapeDtypeStruct((M, N), jnp.bfloat16),
        grid=(M // tm, N // tn),
        in_specs=[
            pl.BlockSpec((tm, H), lambda mi, ni: (mi, 0)),
            pl.BlockSpec((1, H), lambda mi, ni: (0, 0)),
            pl.BlockSpec((H, tn), lambda mi, ni: (0, ni)),
        ],
        out_specs=pl.BlockSpec((tm, tn), lambda mi, ni: (mi, ni)),
        scratch_shapes=[pltpu.VMEM((tm, H), jnp.bfloat16)],
        # ni must be 'arbitrary' so the ni==0 scratch init is never split
        # across cores on v7x megacore.
        compiler_params=_mosaic_params(("parallel", "arbitrary")),
    )(x, ln_w, wqkv)


# --------------------------------------------------- one-shot RoPE on K -----
def _rope_k_kernel(k_ref, cos_ref, sin_ref, o_ref):
    k = k_ref[...].astype(jnp.float32)
    o_ref[...] = _rope(
        k, cos_ref[...].astype(jnp.float32), sin_ref[...].astype(jnp.float32)
    ).astype(o_ref.dtype)


def rope_k(qkv, cos, sin, *, num_heads, num_kv_heads, head_dim, tm=512):
    M = qkv.shape[0]
    D = head_dim
    tm = _tile(M, tm)
    return pl.pallas_call(
        _rope_k_kernel,
        out_shape=jax.ShapeDtypeStruct((M, num_kv_heads * D), jnp.bfloat16),
        grid=(M // tm, num_kv_heads),
        in_specs=[
            # K columns live at block-column index (num_heads + g) of qkv.
            pl.BlockSpec((tm, D), lambda mi, g: (mi, num_heads + g)),
            pl.BlockSpec((tm, D), lambda mi, g: (mi, 0)),
            pl.BlockSpec((tm, D), lambda mi, g: (mi, 0)),
        ],
        out_specs=pl.BlockSpec((tm, D), lambda mi, g: (mi, g)),
        compiler_params=_mosaic_params(("parallel", "parallel")),
    )(qkv, cos, sin)


# ----------------------------------------------------- flash attention core --
def _flash_attn_kernel(q_ref, cq_ref, sq_ref, k_ref, v_ref, o_ref,
                       qrot_sc, m_sc, l_sc, acc_sc, *,
                       scale, tq, tkv, n_rep, d):
    qi = pl.program_id(2)
    ki = pl.program_id(3)
    rows = n_rep * tq
    q_first = qi * tq
    q_last = qi * tq + (tq - 1)
    k_first = ki * tkv
    k_last = ki * tkv + (tkv - 1)

    @pl.when(ki == 0)
    def _init():
        # RoPE + 1/sqrt(d) scale on the q tile, once per (b, g, qi).
        cos = cq_ref[...].astype(jnp.float32)             # (tq, d)
        sin = sq_ref[...].astype(jnp.float32)
        for r in range(n_rep):                            # static unroll
            qh = q_ref[:, r * d:(r + 1) * d].astype(jnp.float32)
            qr = _rope(qh, cos, sin) * scale
            qrot_sc[r * tq:(r + 1) * tq, :] = qr.astype(jnp.bfloat16)
        m_sc[...] = jnp.full((rows, 1), -jnp.inf, jnp.float32)
        l_sc[...] = jnp.zeros((rows, 1), jnp.float32)
        acc_sc[...] = jnp.zeros((rows, d), jnp.float32)

    def _step(apply_mask):
        k = k_ref[...]                                    # (tkv, d) pre-rotated
        v = v_ref[...]                                    # (tkv, d)
        s = jnp.dot(qrot_sc[...], k.T, preferred_element_type=jnp.float32)
        if apply_mask:                                    # diagonal tiles only
            row = lax.broadcasted_iota(jnp.int32, (rows, tkv), 0)
            col = lax.broadcasted_iota(jnp.int32, (rows, tkv), 1)
            q_pos = q_first + row % tq                    # rows are (head, q)
            k_pos = k_first + col
            s = jnp.where(k_pos <= q_pos, s, -1e30)
        m_prev = m_sc[...]
        m_new = jnp.maximum(m_prev, jnp.max(s, axis=-1, keepdims=True))
        alpha = jnp.exp(m_prev - m_new)
        p = jnp.exp(s - m_new)
        l_sc[...] = alpha * l_sc[...] + jnp.sum(p, axis=-1, keepdims=True)
        acc_sc[...] = alpha * acc_sc[...] + jnp.dot(
            p.astype(jnp.bfloat16), v, preferred_element_type=jnp.float32)
        m_sc[...] = m_new

    # Fully-below-diagonal tile: no mask work at all.
    @pl.when(k_last <= q_first)
    def _full():
        _step(False)

    # Tile straddling the diagonal: apply the causal mask.
    @pl.when((k_first <= q_last) & (k_last > q_first))
    def _diag():
        _step(True)

    # Tiles fully above the diagonal are skipped entirely (and their K/V DMA is
    # elided via the clamped index_map in the wrapper).

    @pl.when(ki == pl.num_programs(3) - 1)
    def _finalize():
        l = l_sc[...]
        l = jnp.where(l == 0.0, 1.0, l)                   # guard (never hit: diag valid)
        out = acc_sc[...] * (1.0 / l)
        for r in range(n_rep):
            o_ref[:, r * d:(r + 1) * d] = (
                out[r * tq:(r + 1) * tq, :].astype(o_ref.dtype))


def flash_attention(qkv, k_rot, cos, sin, *, batch, seq, num_heads,
                    num_kv_heads, head_dim, tq=256, tkv=256):
    # qkv: (M, (NH + 2*KVH) * D) with columns ordered [q | k | v]
    # k_rot: (M, KVH * D) pre-rotated keys; cos/sin: (M, D)
    # NOTE: on v5e (128-wide MXU) tq=tkv=128 may be preferable.
    B, S, D = batch, seq, head_dim
    NH, KVH = num_heads, num_kv_heads
    n_rep = NH // KVH
    M = B * S
    tq, tkv = _tile(S, tq), _tile(S, tkv)
    rows = n_rep * tq
    scale = 1.0 / math.sqrt(D)

    def q_map(b, g, qi, ki):
        return (b * (S // tq) + qi, g)

    def qrow_map(b, g, qi, ki):
        return (b * (S // tq) + qi, 0)

    def kv_row(b, qi, ki):
        # Clamp to the causal diagonal so upper-triangle iterations re-use the
        # previous block index and Pallas elides the DMA.
        kc = jnp.minimum(ki, (qi * tq + tq - 1) // tkv)
        return b * (S // tkv) + kc

    def k_map(b, g, qi, ki):
        return (kv_row(b, qi, ki), g)

    def v_map(b, g, qi, ki):
        return (kv_row(b, qi, ki), NH + KVH + g)

    return pl.pallas_call(
        functools.partial(_flash_attn_kernel, scale=scale, tq=tq, tkv=tkv,
                          n_rep=n_rep, d=D),
        out_shape=jax.ShapeDtypeStruct((M, NH * D), jnp.bfloat16),
        grid=(B, KVH, S // tq, S // tkv),
        in_specs=[
            pl.BlockSpec((tq, n_rep * D), q_map),     # q columns of fused qkv
            pl.BlockSpec((tq, D), qrow_map),          # cos for q rows
            pl.BlockSpec((tq, D), qrow_map),          # sin for q rows
            pl.BlockSpec((tkv, D), k_map),            # pre-rotated K
            pl.BlockSpec((tkv, D), v_map),            # v columns of fused qkv
        ],
        out_specs=pl.BlockSpec((tq, n_rep * D), q_map),
        scratch_shapes=[
            pltpu.VMEM((rows, D), jnp.bfloat16),      # rotated+scaled q cache
            pltpu.VMEM((rows, 1), jnp.float32),       # m (running max)
            pltpu.VMEM((rows, 1), jnp.float32),       # l (running denom)
            pltpu.VMEM((rows, D), jnp.float32),       # acc
        ],
        compiler_params=_mosaic_params(
            ("parallel", "parallel", "parallel", "arbitrary")),
    )(qkv, cos, sin, k_rot, qkv)


# --------------------------------------------- output projection + residual --
def _oproj_residual_kernel(a_ref, w_ref, r_ref, o_ref, acc_ref):
    kk = pl.program_id(2)

    @pl.when(kk == 0)
    def _():
        acc_ref[...] = jnp.zeros(acc_ref.shape, acc_ref.dtype)

    acc_ref[...] += jnp.dot(a_ref[...], w_ref[...],
                            preferred_element_type=jnp.float32)

    @pl.when(kk == pl.num_programs(2) - 1)
    def _():
        o_ref[...] = (acc_ref[...] + r_ref[...].astype(jnp.float32)
                      ).astype(o_ref.dtype)


def oproj_residual(attn, wo, residual, *, tm=512, tn=512, tk=512):
    M, K = attn.shape
    N = wo.shape[1]
    tm, tn, tk = _tile(M, tm), _tile(N, tn), _tile(K, tk)
    return pl.pallas_call(
        _oproj_residual_kernel,
        out_shape=jax.ShapeDtypeStruct((M, N), residual.dtype),
        grid=(M // tm, N // tn, K // tk),
        in_specs=[
            pl.BlockSpec((tm, tk), lambda mi, ni, kk: (mi, kk)),
            pl.BlockSpec((tk, tn), lambda mi, ni, kk: (kk, ni)),
            pl.BlockSpec((tm, tn), lambda mi, ni, kk: (mi, ni)),
        ],
        out_specs=pl.BlockSpec((tm, tn), lambda mi, ni, kk: (mi, ni)),
        scratch_shapes=[pltpu.VMEM((tm, tn), jnp.float32)],
        compiler_params=_mosaic_params(("parallel", "parallel", "arbitrary")),
    )(attn, wo, residual)


# ----------------------------- fused post-RMSNorm + SwiGLU MLP + residual ----
def _ln_mlp_kernel(x_ref, w_ref, wgu_ref, wd_ref, o_ref, xn_sc, acc_sc, *,
                   eps, ti):
    ii = pl.program_id(1)

    @pl.when(ii == 0)
    def _():
        x = x_ref[...].astype(jnp.float32)
        var = jnp.mean(x * x, axis=-1, keepdims=True)
        xn = x * lax.rsqrt(var + eps) * w_ref[...].astype(jnp.float32)
        xn_sc[...] = xn.astype(jnp.bfloat16)
        acc_sc[...] = jnp.zeros(acc_sc.shape, acc_sc.dtype)

    xn = xn_sc[...]
    gu = jnp.dot(xn, wgu_ref[...], preferred_element_type=jnp.float32)
    g = gu[:, :ti]                               # fused gate | up tile
    u = gu[:, ti:]
    h = (g * jax.nn.sigmoid(g)) * u              # SiLU(gate) * up
    acc_sc[...] += jnp.dot(h.astype(jnp.bfloat16), wd_ref[...],
                           preferred_element_type=jnp.float32)

    @pl.when(ii == pl.num_programs(1) - 1)
    def _():
        o_ref[...] = (x_ref[...].astype(jnp.float32) + acc_sc[...]
                      ).astype(o_ref.dtype)


def ln_mlp_residual(x, ln_w, wgu, wd, eps, ti, *, tm=512):
    M, H = x.shape
    inter = wd.shape[0]
    assert wgu.shape == (H, 2 * inter) and inter % ti == 0
    tm = _tile(M, tm)
    return pl.pallas_call(
        functools.partial(_ln_mlp_kernel, eps=eps, ti=ti),
        out_shape=jax.ShapeDtypeStruct((M, H), x.dtype),
        grid=(M // tm, inter // ti),
        in_specs=[
            pl.BlockSpec((tm, H), lambda mi, ii: (mi, 0)),
            pl.BlockSpec((1, H), lambda mi, ii: (0, 0)),
            pl.BlockSpec((H, 2 * ti), lambda mi, ii: (0, ii)),
            pl.BlockSpec((ti, H), lambda mi, ii: (ii, 0)),
        ],
        out_specs=pl.BlockSpec((tm, H), lambda mi, ii: (mi, 0)),
        scratch_shapes=[pltpu.VMEM((tm, H), jnp.bfloat16),
                        pltpu.VMEM((tm, H), jnp.float32)],
        compiler_params=_mosaic_params(("parallel", "arbitrary")),
    )(x, ln_w, wgu, wd)


# ---------------------------------------------------------- decoder layer ----
def llama_decoder_layer(params, hidden_states, position_ids, *,
                        num_heads, num_kv_heads, rope_theta, rms_norm_eps):
    B, S, H = hidden_states.shape
    D = H // num_heads
    M = B * S
    assert D % 128 == 0, "head_dim must be lane-aligned (multiple of 128)"

    # Residual stream kept in bf16; f32 math inside the kernels.
    x = hidden_states.reshape(M, H).astype(jnp.bfloat16)

    # Rotary tables gathered by position_ids (tiny host-level glue).
    inv_freq = 1.0 / (rope_theta ** (jnp.arange(0, D, 2, dtype=jnp.float32) / D))
    t = jnp.arange(S, dtype=jnp.float32)
    freqs = jnp.einsum("i,j->ij", t, inv_freq)               # (S, D/2)
    emb = jnp.concatenate([freqs, freqs], axis=-1)           # (S, D)
    cos = jnp.cos(emb)[position_ids].reshape(M, D)           # (M, D) f32
    sin = jnp.sin(emb)[position_ids].reshape(M, D)

    # 1. fused input RMSNorm + QKV projection (Pallas); stays in (M, [q|k|v]).
    qkv = ln_qkv_proj(x, params["input_ln"], params["wqkv"], rms_norm_eps)

    # 2. RoPE applied to K exactly once (prologue kernel).
    k_rot = rope_k(qkv, cos, sin, num_heads=num_heads,
                   num_kv_heads=num_kv_heads, head_dim=D)

    # 3. flash attention: q/v read straight from the fused qkv buffer, output
    #    produced directly in (M, H) layout (no host transposes).
    attn = flash_attention(qkv, k_rot, cos, sin, batch=B, seq=S,
                           num_heads=num_heads, num_kv_heads=num_kv_heads,
                           head_dim=D)

    # 4. output projection + residual add (Pallas, fused).
    hidden = oproj_residual(attn, params["wo"], x)

    # 5. post-attention RMSNorm + fused-gate/up SwiGLU MLP + residual add.
    out = ln_mlp_residual(hidden, params["post_ln"], params["wgu"],
                          params["wd"], rms_norm_eps, params["mlp_ti"])
    return out.reshape(B, S, H).astype(hidden_states.dtype)


# ----------------------------------------------------------- param init ------
def init_params(key, hidden_size, intermediate_size, num_heads, num_kv_heads,
                *, mlp_tile=512):
    head_dim = hidden_size // num_heads
    keys = jax.random.split(key, 7)
    s = 0.02

    def w(k, shape):  # weights stored pre-transposed (in, out) and in bf16
        return (s * jax.random.normal(k, shape, jnp.float32)).astype(jnp.bfloat16)

    nq = num_heads * head_dim
    nkv = num_kv_heads * head_dim
    wq = w(keys[0], (hidden_size, nq))
    wk = w(keys[1], (hidden_size, nkv))
    wv = w(keys[2], (hidden_size, nkv))
    wg = w(keys[4], (hidden_size, intermediate_size))
    wu = w(keys[5], (hidden_size, intermediate_size))

    # Fuse gate/up weights, interleaved at the MLP intermediate-tile
    # granularity, so the MLP kernel issues a single wide matmul per step.
    ti = _tile(intermediate_size, mlp_tile)
    nti = intermediate_size // ti
    wgu = jnp.concatenate(
        [wg.reshape(hidden_size, nti, ti), wu.reshape(hidden_size, nti, ti)],
        axis=2).reshape(hidden_size, 2 * intermediate_size)

    return {
        "wqkv": jnp.concatenate([wq, wk, wv], axis=1),   # fused QKV weight
        "wo": w(keys[3], (nq, hidden_size)),
        "wgu": wgu,                                      # fused gate/up weight
        "wd": w(keys[6], (intermediate_size, hidden_size)),
        "mlp_ti": ti,                                    # tile wgu was fused with
        # RMSNorm weights initialize to ones in the PyTorch module
        "input_ln": jnp.ones((1, hidden_size), jnp.float32),
        "post_ln": jnp.ones((1, hidden_size), jnp.float32),
    }


# TODO(synk): past_key_value (KV-cache concat) / use_cache / output_attentions
# paths are host-level control flow and are not implemented in the kernel.
# TODO(synk): the causal mask is generated in-kernel; arbitrary additive
# attention_mask tensors (e.g. padding masks) are not plumbed through.

if __name__ == "__main__":
    B, S = 2, 8
    hidden_size = 256
    intermediate_size = 512
    num_heads = 2          # head_dim = 128 (lane-aligned)
    num_kv_heads = 1       # GQA with n_rep = 2
    rope_theta = 500000.0
    rms_norm_eps = 1e-5

    key = jax.random.PRNGKey(0)
    k_params, k_x = jax.random.split(key)

    params = init_params(k_params, hidden_size, intermediate_size,
                         num_heads, num_kv_heads)
    hidden_states = jax.random.normal(
        k_x, (B, S, hidden_size), jnp.float32).astype(jnp.bfloat16)
    position_ids = jnp.broadcast_to(jnp.arange(S, dtype=jnp.int32), (B, S))

    out = llama_decoder_layer(
        params,
        hidden_states,
        position_ids,
        num_heads=num_heads,
        num_kv_heads=num_kv_heads,
        rope_theta=rope_theta,
        rms_norm_eps=rms_norm_eps,
    )
    jax.block_until_ready(out)
    assert out.shape == (B, S, hidden_size)
    assert bool(jnp.all(jnp.isfinite(out.astype(jnp.float32))))
    print("KERNEL_OK")
</pallas_src>

<mosaic_0001>
module attributes {stable_mosaic.version = 11 : i64} {
  func.func @_ln_qkv_kernel(%arg0: i32, %arg1: i32, %arg2: memref<16x256xbf16, #tpu.memory_space<vmem>>, %arg3: memref<1x256xf32, #tpu.memory_space<vmem>>, %arg4: memref<256x512xbf16, #tpu.memory_space<vmem>>, %arg5: memref<16x512xbf16, #tpu.memory_space<vmem>>, %arg6: memref<16x256xbf16, #tpu.memory_space<vmem>>) attributes {dimension_semantics = [#tpu.dimension_semantics<parallel>, #tpu.dimension_semantics<arbitrary>], iteration_bounds = array<i64: 1, 1>, scalar_prefetch = 0 : i64, scratch_operands = 1 : i64, tpu.core_type = #tpu.core_type<tc>, window_params = [{transform_indices = @transform_0, window_bounds = array<i64: 16, 256>}, {pipeline_mode = #tpu.pipeline_mode<synchronous>, transform_indices = @transform_1, window_bounds = array<i64: 1, 256>}, {transform_indices = @transform_2, window_bounds = array<i64: 256, 512>}, {transform_indices = @transform_3, window_bounds = array<i64: 16, 512>}]} {
    %c0_i32 = arith.constant 0 : i32
    %0 = arith.cmpi eq, %arg1, %c0_i32 : i32
    %1 = arith.extui %0 : i1 to i32
    %c0_i32_0 = arith.constant 0 : i32
    %2 = arith.cmpi ne, %1, %c0_i32_0 : i32
    scf.if %2 {
      %c0_6 = arith.constant 0 : index
      %c0_7 = arith.constant 0 : index
      %8 = vector.load %arg2[%c0_6, %c0_7] : memref<16x256xbf16, #tpu.memory_space<vmem>>, vector<16x256xbf16>
      %9 = arith.extf %8 : vector<16x256xbf16> to vector<16x256xf32>
      %10 = arith.mulf %9, %9 : vector<16x256xf32>
      %cst_8 = arith.constant dense<0.000000e+00> : vector<16xf32>
      %11 = vector.multi_reduction <add>, %10, %cst_8 [1] : vector<16x256xf32> to vector<16xf32>
      %12 = vector.shape_cast %11 : vector<16xf32> to vector<16x1xf32>
      %cst_9 = arith.constant 2.560000e+02 : f32
      %13 = vector.broadcast %cst_9 : f32 to vector<16x1xf32>
      %14 = arith.divf %12, %13 : vector<16x1xf32>
      %cst_10 = arith.constant 9.99999974E-6 : f32
      %15 = vector.broadcast %cst_10 : f32 to vector<16x1xf32>
      %16 = arith.addf %14, %15 : vector<16x1xf32>
      %17 = math.rsqrt %16 : vector<16x1xf32>
      %18 = vector.broadcast %17 : vector<16x1xf32> to vector<16x256xf32>
      %19 = arith.mulf %9, %18 : vector<16x256xf32>
      %c0_11 = arith.constant 0 : index
      %c0_12 = arith.constant 0 : index
      %20 = vector.load %arg3[%c0_11, %c0_12] : memref<1x256xf32, #tpu.memory_space<vmem>>, vector<1x256xf32>
      %21 = vector.broadcast %20 : vector<1x256xf32> to vector<16x256xf32>
      %22 = arith.mulf %19, %21 : vector<16x256xf32>
      %23 = arith.truncf %22 : vector<16x256xf32> to vector<16x256xbf16>
      %c0_13 = arith.constant 0 : index
      %c0_14 = arith.constant 0 : index
      %24 = vector.load %arg6[%c0_13, %c0_14] : memref<16x256xbf16, #tpu.memory_space<vmem>>, vector<16x256xbf16>
      tpu.vector_store %arg6[%c0_13, %c0_14], %23 {strides = array<i32>} : memref<16x256xbf16, #tpu.memory_space<vmem>>, vector<16x256xbf16>,
    } else {
    }
    %c0 = arith.constant 0 : index
    %c0_1 = arith.constant 0 : index
    %3 = vector.load %arg6[%c0, %c0_1] : memref<16x256xbf16, #tpu.memory_space<vmem>>, vector<16x256xbf16>
    %c0_2 = arith.constant 0 : index
    %c0_3 = arith.constant 0 : index
    %4 = vector.load %arg4[%c0_2, %c0_3] : memref<256x512xbf16, #tpu.memory_space<vmem>>, vector<256x512xbf16>
    %cst = arith.constant dense<0.000000e+00> : vector<16x512xf32>
    %5 = tpu.matmul %3, %4, %cst {dimension_numbers = #tpu.dot_dimension_numbers<[1], [0], [0], [1], [0, 0, 1, 1], [], []>} : vector<16x256xbf16>, vector<256x512xbf16>, vector<16x512xf32> -> vector<16x512xf32>
    %6 = arith.truncf %5 : vector<16x512xf32> to vector<16x512xbf16>
    %c0_4 = arith.constant 0 : index
    %c0_5 = arith.constant 0 : index
    %7 = vector.load %arg5[%c0_4, %c0_5] : memref<16x512xbf16, #tpu.memory_space<vmem>>, vector<16x512xbf16>
    tpu.vector_store %arg5[%c0_4, %c0_5], %6 {strides = array<i32>} : memref<16x512xbf16, #tpu.memory_space<vmem>>, vector<16x512xbf16>,
    return
  }
  func.func @transform_0(%arg0: i32, %arg1: i32) -> (i32, i32) {
    %c0_i32 = arith.constant 0 : i32
    %c0_i32_0 = arith.constant 0 : i32
    return %arg0, %c0_i32 : i32, i32
  }
  func.func @transform_1(%arg0: i32, %arg1: i32) -> (i32, i32) {
    %c0_i32 = arith.constant 0 : i32
    %c0_i32_0 = arith.constant 0 : i32
    %c0_i32_1 = arith.constant 0 : i32
    return %c0_i32, %c0_i32_0 : i32, i32
  }
  func.func @transform_2(%arg0: i32, %arg1: i32) -> (i32, i32) {
    %c0_i32 = arith.constant 0 : i32
    %c0_i32_0 = arith.constant 0 : i32
    return %c0_i32, %arg1 : i32, i32
  }
  func.func @transform_3(%arg0: i32, %arg1: i32) -> (i32, i32) {
    %c0_i32 = arith.constant 0 : i32
    return %arg0, %arg1 : i32, i32
  }
}

</mosaic_0001>

<bundles_post_ra>
// kernel: tpu_custom_call.1
= control target key start
LH: loop header
LB: loop body
LE: loop exit
PB: predicated region body
PF: predicated region fallthrough
CT: control target
= control target key end

     0   :  { %8 = vsyncpa [#allocation4], 0  ;;  %s983_s0 = inlined_call_operand.hbm [shape: bf16[16,256], index: 0, kind: input, shape index: {}]   ;;  %s984_s1 = inlined_call_operand.hbm [shape: f32[1,256], index: 1, kind: input, shape index: {}]   ;;  %s985_s2 = inlined_call_operand.hbm [shape: bf16[256,512], index: 2, kind: input, shape index: {}]   ;;  %s986_s3 = inlined_call_operand.hbm [shape: bf16[16,512], index: 3, kind: output, shape index: {}]  }
   0x1   :  { %9 = vsyncpa [#allocation7], 0 }
   0x2   :  { %10 = vsyncpa [#allocation5], 0  ;;  %s917_s12 = smov [#allocation6]   ;;  %s918_s14 = smov [#allocation3]  }
   0x3   :  { %s29_s13 = sshll.u32 %s917_s12, 4  ;;  %s16_s15 = sshll.u32 %s918_s14, 4  ;;  %s30_s13 = int_to_ptr.vmem [resolvable:$true] %s29_s13  ;;  %s17_s15 = int_to_ptr.vmem [resolvable:$true] %s16_s15 }
   0x4   :  { %s839_s16 = scalar_lea.vmem %s30_s13, 32  ;;  %p844_p1 = scmp.lt.s32.totalorder %s30_s13, %s30_s13 }
   0x5   :  { %p840_p0 = scmp.ne.s32.totalorder %s30_s13, %s839_s16  ;;  %p845_p2 = scmp.lt.s32.totalorder %s839_s16, %s839_s16 }
   0x7   :  { %p846_p3 = por %p845_p2, %p844_p1 }
   0x9   :  { %p847_p4 = pnand %p846_p3, %p840_p0 }
   0xb   :  { %850 = shalt.err (!%p847_p4)
}
   0xc   :  { %32 = dma.hbm_to_vmem [thread:$0]  %s984_s1, 32, %s30_s13, [#allocation7]  }
   0xd   :  { %s859_s19 = scalar_lea.vmem %s17_s15, 256  ;;  %p864_p6 = scmp.lt.s32.totalorder %s17_s15, %s17_s15 }
   0xe   :  { %p860_p5 = scmp.ne.s32.totalorder %s17_s15, %s859_s19  ;;  %p865_p7 = scmp.lt.s32.totalorder %s859_s19, %s859_s19 }
  0x10   :  { %p866_p8 = por %p865_p7, %p864_p6 }
  0x12   :  { %p867_p9 = pnand %p866_p8, %p860_p5 }
  0x14   :  { %870 = shalt.err (!%p867_p9)
}
  0x15   :  { %s919_s20 = smov 128   ;;  %s920_s21 = smov 8  }
  0x16   :  { %22 = dma.hbm_to_vmem [thread:$0]  %s983_s0, 256, %s17_s15, [#allocation4], %s919_s20, %s919_s20, %s920_s21  }
  0x17   :  { %s921_s24 = smov [#allocation8]  }
  0x18   :  { %s38_s25 = sshll.u32 %s921_s24, 4  ;;  %s39_s25 = int_to_ptr.vmem [resolvable:$true] %s38_s25 }
  0x19   :  { %s879_s26 = scalar_lea.vmem %s39_s25, 8192  ;;  %p884_p11 = scmp.lt.s32.totalorder %s39_s25, %s39_s25 }
  0x1a   :  { %p880_p10 = scmp.ne.s32.totalorder %s39_s25, %s879_s26  ;;  %p885_p12 = scmp.lt.s32.totalorder %s879_s26, %s879_s26 }
  0x1c   :  { %p886_p13 = por %p885_p12, %p884_p11 }
  0x1e   :  { %p887_p0 = pnand %p886_p13, %p880_p10 }
  0x20   :  { %890 = shalt.err (!%p887_p0)
}
  0x21   :  { %s922_s1 = smov 256   ;;  %s923_s27 = smov 16  }
  0x22   :  { %44 = dma.hbm_to_vmem [thread:$0]  %s985_s2, 8192, %s39_s25, [#allocation7], %s922_s1, %s922_s1, %s923_s27  }
  0x23   :  { %911 = dma.done.wait [#allocation4], 256  }
  0x24   :  { %912 = vsyncadd [#allocation4], 4294967040 }
  0x25   :  { %913 = dma.done.wait [#allocation7], 8224  }
  0x26   :  { %914 = vsyncadd [#allocation7], 4294959072  ;;  %v58_v0 = vld [vmem:[#allocation3] sm:$0xff]  ;;  %v59_v1 = vld [vmem:[#allocation3 + $0x8] sm:$0xff]  ;;  %s924_s0 = smov [#allocation9]  }
  0x27   :  { %v957_v2 = vunpack.c.l.bf16 %v58_v0  ;;  %v959_v3 = vunpack.c.h.bf16 %v58_v0  ;;  %v961_v4 = vunpack.c.l.bf16 %v59_v1  ;;  %v963_v5 = vunpack.c.h.bf16 %v59_v1  ;;  %v731_v6 = vld [vmem:[#allocation8 + $0xe4] ss:$16 sps:$4 sm:$0xff]   ;;  %v733_v7 = vld [vmem:[#allocation8 + $0xec] ss:$16 sps:$4 sm:$0xff]   ;;  %v735_v8 = vld [vmem:[#allocation8 + $0xe0] ss:$16 sps:$4 sm:$0xff]  }
  0x28   :  { %511 = vmatprep.subr.bf16.mxu0 %v731_v6  ;;  %v736_v13 = vld [vmem:[#allocation8 + $0xe8] ss:$16 sps:$4 sm:$0xff]   ;;  %554 = vmatprep.subr.bf16.mxu1 %v733_v7  ;;  %v737_v14 = vld [vmem:[#allocation8 + $0xc4] ss:$16 sps:$4 sm:$0xff]   ;;  %v739_v16 = vld [vmem:[#allocation8 + $0xcc] ss:$16 sps:$4 sm:$0xff]  }
  0x29   :  { %v64_v9 = vmul.f32 %v957_v2, %v957_v2  ;;  %v65_v10 = vmul.f32 %v959_v3, %v959_v3  ;;  %v66_v11 = vmul.f32 %v961_v4, %v961_v4  ;;  %v67_v12 = vmul.f32 %v963_v5, %v963_v5  ;;  %512 = vmatpush1.bf16.msra.mxu0 %v735_v8  ;;  %v741_v17 = vld [vmem:[#allocation8 + $0xc0] ss:$16 sps:$4 sm:$0xff]   ;;  %v742_v18 = vld [vmem:[#allocation8 + $0xc8] ss:$16 sps:$4 sm:$0xff]   ;;  %v743_v19 = vld [vmem:[#allocation8 + $0xa4] ss:$16 sps:$4 sm:$0xff]  }
  0x2a   :  { %555 = vmatpush1.bf16.msra.mxu1 %v736_v13  ;;  %513 = vmatprep.subr.bf16.mxu0 %v737_v14  ;;  %v745_v21 = vld [vmem:[#allocation8 + $0xac] ss:$16 sps:$4 sm:$0xff]   ;;  %v747_v22 = vld [vmem:[#allocation8 + $0xa0] ss:$16 sps:$4 sm:$0xff]   ;;  %v748_v23 = vld [vmem:[#allocation8 + $0xa8] ss:$16 sps:$4 sm:$0xff]  }
  0x2b   :  { %v68_v15 = vadd.f32 %v65_v10, %v64_v9  ;;  %v71_v20 = vadd.f32 %v67_v12, %v66_v11  ;;  %556 = vmatprep.subr.bf16.mxu1 %v739_v16  ;;  %v749_v24 = vld [vmem:[#allocation8 + $0x84] ss:$16 sps:$4 sm:$0xff]   ;;  %v751_v25 = vld [vmem:[#allocation8 + $0x8c] ss:$16 sps:$4 sm:$0xff]   ;;  %v753_v26 = vld [vmem:[#allocation8 + $0x80] ss:$16 sps:$4 sm:$0xff]  }
  0x2c   :  { %v754_v27 = vld [vmem:[#allocation8 + $0x88] ss:$16 sps:$4 sm:$0xff]   ;;  %v755_v28 = vld [vmem:[#allocation8 + $0x64] ss:$16 sps:$4 sm:$0xff]   ;;  %v757_v29 = vld [vmem:[#allocation8 + $0x6c] ss:$16 sps:$4 sm:$0xff]  }
  0x2d   :  { %69 = vadd.xlane.f32.xlu0 %v68_v15  ;;  %514 = vmatpush1.bf16.msra.mxu0 %v741_v17  ;;  %v759_v30 = vld [vmem:[#allocation8 + $0x60] ss:$16 sps:$4 sm:$0xff]   ;;  %v760_v31 = vld [vmem:[#allocation8 + $0x68] ss:$16 sps:$4 sm:$0xff]   ;;  %v761_v32 = vld [vmem:[#allocation8 + $0x44] ss:$16 sps:$4 sm:$0xff]  }
  0x2e   :  { %557 = vmatpush1.bf16.msra.mxu1 %v742_v18  ;;  %515 = vmatprep.subr.bf16.mxu0 %v743_v19  ;;  %v763_v33 = vld [vmem:[#allocation8 + $0x4c] ss:$16 sps:$4 sm:$0xff]   ;;  %v765_v34 = vld [vmem:[#allocation8 + $0x40] ss:$16 sps:$4 sm:$0xff]   ;;  %v766_v35 = vld [vmem:[#allocation8 + $0x48] ss:$16 sps:$4 sm:$0xff]  }
  0x2f   :  { %558 = vmatprep.subr.bf16.mxu1 %v745_v21  ;;  %v767_v36 = vld [vmem:[#allocation8 + $0x24] ss:$16 sps:$4 sm:$0xff]   ;;  %v769_v37 = vld [vmem:[#allocation8 + $0x2c] ss:$16 sps:$4 sm:$0xff]   ;;  %v771_v38 = vld [vmem:[#allocation8 + $0x20] ss:$16 sps:$4 sm:$0xff]  }
  0x30   :  { %v772_v39 = vld [vmem:[#allocation8 + $0x28] ss:$16 sps:$4 sm:$0xff]   ;;  %v773_v40 = vld [vmem:[#allocation8 + $0x4] ss:$16 sps:$4 sm:$0xff]   ;;  %v775_v41 = vld [vmem:[#allocation8 + $0xc] ss:$16 sps:$4 sm:$0xff]  }
  0x31   :  { %72 = vadd.xlane.f32.xlu0 %v71_v20  ;;  %516 = vmatpush1.bf16.msra.mxu0 %v747_v22  ;;  %v777_v42 = vld [vmem:[#allocation8] ss:$16 sps:$4 sm:$0xff]   ;;  %v778_v43 = vld [vmem:[#allocation8 + $0x8] ss:$16 sps:$4 sm:$0xff]   ;;  %v779_v44 = vld [vmem:[#allocation8 + $0x1e4] ss:$16 sps:$4 sm:$0xff]   ;;  %v87_v22 = vlaneseq }
  0x32   :  { %559 = vmatpush1.bf16.msra.mxu1 %v748_v23  ;;  %517 = vmatprep.subr.bf16.mxu0 %v749_v24  ;;  %v781_v45 = vld [vmem:[#allocation8 + $0x1ec] ss:$16 sps:$4 sm:$0xff]   ;;  %v783_v46 = vld [vmem:[#allocation8 + $0x1e0] ss:$16 sps:$4 sm:$0xff]   ;;  %v784_v47 = vld [vmem:[#allocation8 + $0x1e8] ss:$16 sps:$4 sm:$0xff]  }
  0x33   :  { %560 = vmatprep.subr.bf16.mxu1 %v751_v25  ;;  %v785_v48 = vld [vmem:[#allocation8 + $0x1c4] ss:$16 sps:$4 sm:$0xff]   ;;  %v787_v49 = vld [vmem:[#allocation8 + $0x1cc] ss:$16 sps:$4 sm:$0xff]   ;;  %v789_v50 = vld [vmem:[#allocation8 + $0x1c0] ss:$16 sps:$4 sm:$0xff]  }
  0x34   :  { %v790_v51 = vld [vmem:[#allocation8 + $0x1c8] ss:$16 sps:$4 sm:$0xff]   ;;  %v791_v52 = vld [vmem:[#allocation8 + $0x1a4] ss:$16 sps:$4 sm:$0xff]   ;;  %v793_v53 = vld [vmem:[#allocation8 + $0x1ac] ss:$16 sps:$4 sm:$0xff]  }
  0x35   :  { %518 = vmatpush1.bf16.msra.mxu0 %v753_v26  ;;  %v795_v54 = vld [vmem:[#allocation8 + $0x1a0] ss:$16 sps:$4 sm:$0xff]   ;;  %v796_v55 = vld [vmem:[#allocation8 + $0x1a8] ss:$16 sps:$4 sm:$0xff]   ;;  %v797_v56 = vld [vmem:[#allocation8 + $0x184] ss:$16 sps:$4 sm:$0xff]  }
  0x36   :  { %561 = vmatpush1.bf16.msra.mxu1 %v754_v27  ;;  %519 = vmatprep.subr.bf16.mxu0 %v755_v28  ;;  %v799_v57 = vld [vmem:[#allocation8 + $0x18c] ss:$16 sps:$4 sm:$0xff]   ;;  %v801_v58 = vld [vmem:[#allocation8 + $0x180] ss:$16 sps:$4 sm:$0xff]   ;;  %v802_v59 = vld [vmem:[#allocation8 + $0x188] ss:$16 sps:$4 sm:$0xff]  }
  0x37   :  { %562 = vmatprep.subr.bf16.mxu1 %v757_v29  ;;  %v803_v60 = vld [vmem:[#allocation8 + $0x164] ss:$16 sps:$4 sm:$0xff]   ;;  %v805_v61 = vld [vmem:[#allocation8 + $0x16c] ss:$16 sps:$4 sm:$0xff]   ;;  %v807_v62 = vld [vmem:[#allocation8 + $0x160] ss:$16 sps:$4 sm:$0xff]  }
  0x38   :  { %v808_v63 = vld [vmem:[#allocation8 + $0x168] ss:$16 sps:$4 sm:$0xff]   ;;  %v809_v0 = vld [vmem:[#allocation8 + $0x144] ss:$16 sps:$4 sm:$0xff]   ;;  %v811_v1 = vld [vmem:[#allocation8 + $0x14c] ss:$16 sps:$4 sm:$0xff]  }
  0x39   :  { %520 = vmatpush1.bf16.msra.mxu0 %v759_v30  ;;  %v813_v6 = vld [vmem:[#allocation8 + $0x140] ss:$16 sps:$4 sm:$0xff]   ;;  %v814_v7 = vld [vmem:[#allocation8 + $0x148] ss:$16 sps:$4 sm:$0xff]   ;;  %v815_v8 = vld [vmem:[#allocation8 + $0x124] ss:$16 sps:$4 sm:$0xff]  }
  0x3a   :  { %563 = vmatpush1.bf16.msra.mxu1 %v760_v31  ;;  %521 = vmatprep.subr.bf16.mxu0 %v761_v32  ;;  %v817_v9 = vld [vmem:[#allocation8 + $0x12c] ss:$16 sps:$4 sm:$0xff]   ;;  %v819_v10 = vld [vmem:[#allocation8 + $0x120] ss:$16 sps:$4 sm:$0xff]   ;;  %v820_v11 = vld [vmem:[#allocation8 + $0x128] ss:$16 sps:$4 sm:$0xff]  }
  0x3b   :  { %564 = vmatprep.subr.bf16.mxu1 %v763_v33  ;;  %v821_v12 = vld [vmem:[#allocation8 + $0x104] ss:$16 sps:$4 sm:$0xff]   ;;  %v823_v13 = vld [vmem:[#allocation8 + $0x10c] ss:$16 sps:$4 sm:$0xff]   ;;  %v825_v14 = vld [vmem:[#allocation8 + $0x100] ss:$16 sps:$4 sm:$0xff]  }
  0x3c   :  { %v826_v15 = vld [vmem:[#allocation8 + $0x108] ss:$16 sps:$4 sm:$0xff]   ;;  %v88_v23 = vshrl.u32 %v87_v22, 7  ;;  %v85_v27 = vld [vmem:[#allocation6] sm:$0x3]  ;;  %s630_s2 = sshll.u32 %s924_s0, 4  ;;  %s631_s2 = int_to_ptr.vmem [resolvable:$true] %s630_s2 }
  0x3d   :  { %522 = vmatpush1.bf16.msra.mxu0 %v765_v34  ;;  %s891_s30 = scalar_lea.vmem %s631_s2, 512  ;;  %p896_p2 = scmp.lt.s32.totalorder %s631_s2, %s631_s2 }
  0x3e   :  { %565 = vmatpush1.bf16.msra.mxu1 %v766_v35  ;;  %523 = vmatprep.subr.bf16.mxu0 %v767_v36  ;;  %v89_v24 = vsub.s32 0, %v88_v23  ;;  %v93_v25 = vsub.s32 1, %v88_v23  ;;  %p892_p1 = scmp.ne.s32.totalorder %s631_s2, %s891_s30  ;;  %p897_p3 = scmp.lt.s32.totalorder %s891_s30, %s891_s30 }
  0x3f   :  { %566 = vmatprep.subr.bf16.mxu1 %v769_v37 }
  0x40   :  { %v90_v29 = vrot.slane %v85_v27, %v89_v24  ;;  %v94_v30 = vrot.slane %v85_v27, %v93_v25  ;;  %p898_p4 = por %p897_p3, %p896_p2 }
  0x41   :  { %524 = vmatpush1.bf16.msra.mxu0 %v771_v38 }
  0x42   :  { %567 = vmatpush1.bf16.msra.mxu1 %v772_v39  ;;  %525 = vmatprep.subr.bf16.mxu0 %v773_v40  ;;  %p899_p5 = pnand %p898_p4, %p892_p1 }
  0x43   :  { %568 = vmatprep.subr.bf16.mxu1 %v775_v41 }
  0x45   :  { %526 = vmatpush1.bf16.msra.mxu0 %v777_v42 }
  0x46   :  { %569 = vmatpush1.bf16.msra.mxu1 %v778_v43  ;;  %527 = vmatprep.subr.bf16.mxu0 %v779_v44 }
  0x47   :  { %570 = vmatprep.subr.bf16.mxu1 %v781_v45 }
  0x49   :  { %528 = vmatpush2.bf16.msra.mxu0 %v783_v46 }
  0x4a   :  { %571 = vmatpush2.bf16.msra.mxu1 %v784_v47  ;;  %529 = vmatprep.subr.bf16.mxu0 %v785_v48 }
  0x4b   :  { %572 = vmatprep.subr.bf16.mxu1 %v787_v49 }
  0x4d   :  { %530 = vmatpush2.bf16.msra.mxu0 %v789_v50 }
  0x4e   :  { %573 = vmatpush2.bf16.msra.mxu1 %v790_v51  ;;  %531 = vmatprep.subr.bf16.mxu0 %v791_v52 }
  0x4f   :  { %574 = vmatprep.subr.bf16.mxu1 %v793_v53 }
  0x51   :  { %532 = vmatpush2.bf16.msra.mxu0 %v795_v54 }
  0x52   :  { %575 = vmatpush2.bf16.msra.mxu1 %v796_v55  ;;  %533 = vmatprep.subr.bf16.mxu0 %v797_v56 }
  0x53   :  { %576 = vmatprep.subr.bf16.mxu1 %v799_v57 }
  0x55   :  { %534 = vmatpush2.bf16.msra.mxu0 %v801_v58 }
  0x56   :  { %577 = vmatpush2.bf16.msra.mxu1 %v802_v59  ;;  %535 = vmatprep.subr.bf16.mxu0 %v803_v60 }
  0x57   :  { %578 = vmatprep.subr.bf16.mxu1 %v805_v61 }
  0x59   :  { %536 = vmatpush2.bf16.msra.mxu0 %v807_v62 }
  0x5a   :  { %579 = vmatpush2.bf16.msra.mxu1 %v808_v63  ;;  %537 = vmatprep.subr.bf16.mxu0 %v809_v0 }
  0x5b   :  { %580 = vmatprep.subr.bf16.mxu1 %v811_v1 }
  0x5d   :  { %538 = vmatpush2.bf16.msra.mxu0 %v813_v6 }
  0x5e   :  { %581 = vmatpush2.bf16.msra.mxu1 %v814_v7  ;;  %539 = vmatprep.subr.bf16.mxu0 %v815_v8 }
  0x5f   :  { %582 = vmatprep.subr.bf16.mxu1 %v817_v9 }
  0x61   :  { %540 = vmatpush2.bf16.msra.mxu0 %v819_v10 }
  0x62   :  { %583 = vmatpush2.bf16.msra.mxu1 %v820_v11  ;;  %541 = vmatprep.subr.bf16.mxu0 %v821_v12 }
  0x63   :  { %584 = vmatprep.subr.bf16.mxu1 %v823_v13 }
  0x65   :  { %542 = vmatpush2.bf16.msra.mxu0 %v825_v14 }
  0x66   :  { %585 = vmatpush2.bf16.msra.mxu1 %v826_v15 }
  0xb6   :  { %v70_v16 = vpop.xlane.xlu0 %69 }
  0xb7   :  { %v75_v17 = vmul.f32 0.00390625, %v70_v16 }
  0xb9   :  { %v77_v18 = vadd.f32 1e-05, %v75_v17 }
  0xba   :  { %v73_v19 = vpop.xlane.xlu0 %72 }
  0xbb   :  { %827 = vrsqrt.f32 %v77_v18  ;;  %v76_v20 = vmul.f32 0.00390625, %v73_v19 }
  0xbd   :  { %v78_v21 = vadd.f32 1e-05, %v76_v20 }
  0xbf   :  { %829 = vrsqrt.f32 %v78_v21 }
  0xc8   :  { %v828_v26 = vpop.eup %827 }
  0xc9   :  { %v82_v28 = vmul.f32 %v828_v26, %v959_v3  ;;  %v81_v31 = vmul.f32 %v828_v26, %v957_v2 }
  0xcb   :  { %v98_v35 = vmul.f32 %v94_v30, %v82_v28  ;;  %v97_v37 = vmul.f32 %v90_v29, %v81_v31 }
  0xcc   :  { %v830_v32 = vpop.eup %829 }
  0xcd   :  { %v84_v33 = vmul.f32 %v830_v32, %v963_v5  ;;  %v83_v34 = vmul.f32 %v830_v32, %v961_v4 }
  0xcf   :  { %v100_v36 = vmul.f32 %v94_v30, %v84_v33  ;;  %v99_v38 = vmul.f32 %v90_v29, %v83_v34 }
  0xd1   :  { %v722_v39 = vpack.c.bf16 %v100_v36, %v98_v35  ;;  %v721_v40 = vpack.c.bf16 %v99_v38, %v97_v37 }
  0xd3   :  { %543 = vmatprep.mubr.bf16.mxu0 %v722_v39  ;;  %586 = vmatprep.mubr.bf16.mxu1 %v722_v39 }
  0xd4   :  { %544 = vmatmul.mubr.bf16.vlgmr.msra.gmra.mxu0 %v721_v40  ;;  %587 = vmatmul.mubr.bf16.vlgmr.msra.gmra.mxu1 %v721_v40 }
 0x194   :  { %v545_v3 = vpop.f32.mrf.mxu0  ;;  %v588_v41 = vpop.f32.mrf.mxu1 }
 0x196   :  { %v547_v42 = vpop.f32.mrf.mxu0  ;;  %v590_v43 = vpop.f32.mrf.mxu1 }
 0x197   :  { %v717_v2 = vpack.c.bf16 %v547_v42, %v545_v3  ;;  %v718_v44 = vpack.c.bf16 %v590_v43, %v588_v41 }
 0x198   :  { %v549_v45 = vpop.f32.mrf.mxu0  ;;  %v592_v5 = vpop.f32.mrf.mxu1 }
 0x199   :  { %621 = vst [vmem:[#allocation9] sm:$0xff] %v717_v2  ;;  %622 = vst [vmem:[#allocation9 + $0x8] sm:$0xff] %v718_v44 }
 0x19a   :  { %v551_v4 = vpop.f32.mrf.mxu0  ;;  %v594_v46 = vpop.f32.mrf.mxu1 }
 0x19b   :  { %v719_v47 = vpack.c.bf16 %v551_v4, %v549_v45  ;;  %v720_v48 = vpack.c.bf16 %v594_v46, %v592_v5 }
 0x19d   :  { %623 = vst [vmem:[#allocation9 + $0x10] sm:$0xff] %v719_v47  ;;  %624 = vst [vmem:[#allocation9 + $0x18] sm:$0xff] %v720_v48 }
 0x19e   :  { %902 = shalt.err (!%p899_p5)
}
 0x19f   :  { %636 = dma.vmem_to_hbm [thread:$0]  %s631_s2, 512, %s986_s3, [#allocation5], %s922_s1, %s922_s1, %s923_s27  }
 0x1a0   :  { %915 = dma.done.wait [#allocation5], 512  }
 0x1a1   :  { %916 = vsyncadd [#allocation5], 4294966784 }
 0x1a2   :  { %640 = vsyncpa [#allocation4], 1 }
 0x1a3   :  { %641 = vsyncpa [#allocation7], 1 }
 0x1a4   :  { %642 = vsyncpa [#allocation5], 1 }

</bundles_post_ra>
